<compile_context>
chip_gen: v6e
topology: v6e:2x2x1
jax: 0.10.0
libtpu: 0.0.40
codegen_flags: <defaults>
</compile_context>

<pallas_src>
import functools

import jax
import jax.numpy as jnp
from jax.experimental import pallas as pl
from jax.experimental.pallas import tpu as pltpu


def _max_tile_bytes() -> int:
    """Per-operand block size: 4 MiB on v6e/v7x, 2 MiB on v5e/unknown chips.

    4 MiB x 2 double-buffers x 2 operands = 16 MiB fits the 32 MiB scoped-VMEM
    default on v6e/v7x; on v5e (16 MiB scoped default) we stay at 2 MiB, which
    is already at the ~820 GB/s HBM roofline there.
    """
    try:
        kind = jax.devices()[0].device_kind.lower()
    except Exception:
        return 2 << 20
    if "v6" in kind or "v7" in kind:
        return 4 << 20
    return 2 << 20


def _pick_lanes(n: int) -> int:
    """Largest lane-dense width in {512, 256, 128} that divides n (else 128)."""
    for lanes in (512, 256):
        if n % lanes == 0:
            return lanes
    return 128


def _pick_tile_rows(rows: int, lanes: int, itemsize: int) -> int:
    """Block height: multiple of 8, generation/dtype-aware size, >= ~4 grid steps."""
    max_rows = max(8, (_max_tile_bytes() // (lanes * itemsize)) // 8 * 8)
    if rows < 64:
        return rows  # truly tiny: single full-extent block is allowed & cheapest
    tr = min(max_rows, pl.cdiv(rows, 4))  # >=4 steps: pipelining + v7x megacore
    return max(8, (tr // 8) * 8)


def _dropout_prng_kernel(seed_ref, x_ref, o_ref, *, thr: int, scale: float):
    """Fast path: on-chip hardware PRNG + integer-threshold dropout."""
    # Distinct stream per grid step so tiles (and the two v7x cores) never
    # reuse a mask.
    pltpu.prng_seed(seed_ref[0] + pl.program_id(0))
    # TODO(synk): for sub-32-bit dtypes draw half/quarter-width bits (uint16
    # lanes + 16-bit threshold) to halve PRNG/VPU work and vreg pressure.
    bits = pltpu.bitcast(pltpu.prng_random_bits(x_ref.shape), jnp.uint32)
    keep = bits >= jnp.uint32(thr)
    xv = x_ref[...]
    scaled = (xv.astype(jnp.float32) * jnp.float32(scale)).astype(xv.dtype)
    o_ref[...] = jnp.where(keep, scaled, jnp.zeros_like(xv))


def _dropout_bits_kernel(bits_ref, x_ref, o_ref, *, thr: int, scale: float):
    """Portable path (non-TPU backends): random bits streamed as an operand."""
    keep = bits_ref[...] >= jnp.uint32(thr)
    xv = x_ref[...]
    scaled = (xv.astype(jnp.float32) * jnp.float32(scale)).astype(xv.dtype)
    o_ref[...] = jnp.where(keep, scaled, jnp.zeros_like(xv))


def dropout(x: jax.Array, p: float, seed: int, training: bool = True) -> jax.Array:
    """Dropout with drop probability `p`; matches the PyTorch module's forward
    (training mode zeroes with prob p and scales kept activations by 1/(1-p))."""
    if not training or p == 0.0:
        return x
    assert 0.0 <= p < 1.0, "p must be in [0, 1)"

    orig_shape = x.shape
    n = x.size
    # Keep element iff uint32 bits >= thr.
    thr = min(int(round(p * 2.0 ** 32)), 2 ** 32 - 1)
    scale = 1.0 / (1.0 - p)

    flat = x.reshape(-1)
    lanes = _pick_lanes(n)
    main = (n // lanes) * lanes
    tail = n - main  # < 128 elements, handled outside the kernel

    pieces = []
    if main > 0:
        rows = main // lanes
        tile_rows = _pick_tile_rows(rows, lanes, x.dtype.itemsize)
        num_tiles = pl.cdiv(rows, tile_rows)
        x2d = flat[:main].reshape(rows, lanes)
        out_shape = jax.ShapeDtypeStruct((rows, lanes), x.dtype)
        cparams = pltpu.CompilerParams(dimension_semantics=("parallel",))

        if jax.default_backend() == "tpu":
            # On-chip PRNG path: 2 x itemsize bytes of HBM traffic per element.
            cost = pl.CostEstimate(
                flops=2 * main, transcendentals=0,
                bytes_accessed=2 * main * x.dtype.itemsize)
            out2d = pl.pallas_call(
                functools.partial(_dropout_prng_kernel, thr=thr, scale=scale),
                out_shape=out_shape,
                grid_spec=pltpu.PrefetchScalarGridSpec(
                    num_scalar_prefetch=1,  # seed lands in SMEM before the grid runs
                    grid=(num_tiles,),
                    in_specs=[pl.BlockSpec((tile_rows, lanes), lambda i, s: (i, 0))],
                    out_specs=pl.BlockSpec((tile_rows, lanes), lambda i, s: (i, 0)),
                ),
                compiler_params=cparams,
                cost_estimate=cost,
            )(jnp.array([seed], dtype=jnp.int32), x2d)
        else:
            # Portable fallback: pre-generated jax.random bits streamed in.
            # TODO(synk): use uint16 bits + 16-bit threshold to shrink this stream.
            bits = jax.random.bits(jax.random.PRNGKey(seed), (rows, lanes),
                                   dtype=jnp.uint32)
            cost = pl.CostEstimate(
                flops=2 * main, transcendentals=0,
                bytes_accessed=main * (2 * x.dtype.itemsize + 4))
            out2d = pl.pallas_call(
                functools.partial(_dropout_bits_kernel, thr=thr, scale=scale),
                out_shape=out_shape,
                grid_spec=pltpu.PrefetchScalarGridSpec(
                    num_scalar_prefetch=0,
                    grid=(num_tiles,),
                    in_specs=[pl.BlockSpec((tile_rows, lanes), lambda i: (i, 0)),
                              pl.BlockSpec((tile_rows, lanes), lambda i: (i, 0))],
                    out_specs=pl.BlockSpec((tile_rows, lanes), lambda i: (i, 0)),
                ),
                compiler_params=cparams,
                cost_estimate=cost,
            )(bits, x2d)
        pieces.append(out2d.reshape(-1))

    if tail > 0:
        # Tiny leftover (< 128 elems): plain jnp, negligible vs. padding the
        # whole array (which would cost two full extra HBM passes).
        tail_bits = jax.random.bits(
            jax.random.fold_in(jax.random.PRNGKey(seed), 1), (tail,),
            dtype=jnp.uint32)
        keep = tail_bits >= jnp.uint32(thr)
        tail_x = flat[main:]
        tail_out = jnp.where(
            keep, (tail_x.astype(jnp.float32) * scale).astype(x.dtype),
            jnp.zeros_like(tail_x))
        pieces.append(tail_out)

    out_flat = pieces[0] if len(pieces) == 1 else jnp.concatenate(pieces)
    return out_flat.reshape(orig_shape)


if __name__ == "__main__":
    key = jax.random.PRNGKey(0)
    # NCHW, small shapes: batch=2, channels=4, spatial=16x16  -> 2048 elements
    x = jax.random.normal(key, (2, 4, 16, 16), dtype=jnp.float32)
    p = 0.3

    out = jax.block_until_ready(dropout(x, p=p, seed=1234, training=True))

    # Sanity checks: shape/dtype preserved; outputs are either 0 or x/(1-p).
    assert out.shape == x.shape and out.dtype == x.dtype
    scaled = x / (1.0 - p)
    is_zero = jnp.isclose(out, 0.0, atol=1e-6)
    is_scaled = jnp.isclose(out, scaled, rtol=1e-5, atol=1e-6)
    assert bool(jnp.all(is_zero | is_scaled))
    # Drop fraction should be in the vicinity of p (loose bound, n = 2048).
    zero_frac = float(jnp.mean(out == 0.0))
    assert 0.15 < zero_frac < 0.45, zero_frac
    # Eval mode is identity.
    assert bool(jnp.all(dropout(x, p=p, seed=1234, training=False) == x))

    print("KERNEL_OK")
</pallas_src>

<mosaic_0001>
module attributes {stable_mosaic.version = 11 : i64} {
  func.func @_dropout_bits_kernel(%arg0: i32, %arg1: memref<4x512xi32, #tpu.memory_space<vmem>>, %arg2: memref<4x512xf32, #tpu.memory_space<vmem>>, %arg3: memref<4x512xf32, #tpu.memory_space<vmem>>) attributes {dimension_semantics = [#tpu.dimension_semantics<parallel>], iteration_bounds = array<i64: 1>, scalar_prefetch = 0 : i64, scratch_operands = 0 : i64, tpu.core_type = #tpu.core_type<tc>, window_params = [{transform_indices = @transform_0, window_bounds = array<i64: 4, 512>}, {transform_indices = @transform_1, window_bounds = array<i64: 4, 512>}, {transform_indices = @transform_2, window_bounds = array<i64: 4, 512>}]} {
    %c0 = arith.constant 0 : index
    %c0_0 = arith.constant 0 : index
    %0 = vector.load %arg1[%c0, %c0_0] : memref<4x512xi32, #tpu.memory_space<vmem>>, vector<4x512xi32>
    %c1288490189_i32 = arith.constant 1288490189 : i32
    %1 = vector.broadcast %c1288490189_i32 : i32 to vector<4x512xi32>
    %2 = arith.cmpi uge, %0, %1 : vector<4x512xi32>
    %c0_1 = arith.constant 0 : index
    %c0_2 = arith.constant 0 : index
    %3 = vector.load %arg2[%c0_1, %c0_2] : memref<4x512xf32, #tpu.memory_space<vmem>>, vector<4x512xf32>
    %cst = arith.constant 1.42857146 : f32
    %4 = vector.broadcast %cst : f32 to vector<4x512xf32>
    %5 = arith.mulf %3, %4 : vector<4x512xf32>
    %cst_3 = arith.constant 0.000000e+00 : f32
    %6 = vector.broadcast %cst_3 : f32 to vector<4x512xf32>
    %7 = arith.select %2, %5, %6 : vector<4x512xi1>, vector<4x512xf32>
    %c0_4 = arith.constant 0 : index
    %c0_5 = arith.constant 0 : index
    %8 = vector.load %arg3[%c0_4, %c0_5] : memref<4x512xf32, #tpu.memory_space<vmem>>, vector<4x512xf32>
    tpu.vector_store %arg3[%c0_4, %c0_5], %7 {strides = array<i32>} : memref<4x512xf32, #tpu.memory_space<vmem>>, vector<4x512xf32>,
    return
  }
  func.func @transform_0(%arg0: i32) -> (i32, i32) {
    %c0_i32 = arith.constant 0 : i32
    %c0_i32_0 = arith.constant 0 : i32
    return %arg0, %c0_i32 : i32, i32
  }
  func.func @transform_1(%arg0: i32) -> (i32, i32) {
    %c0_i32 = arith.constant 0 : i32
    %c0_i32_0 = arith.constant 0 : i32
    return %arg0, %c0_i32 : i32, i32
  }
  func.func @transform_2(%arg0: i32) -> (i32, i32) {
    %c0_i32 = arith.constant 0 : i32
    %c0_i32_0 = arith.constant 0 : i32
    return %arg0, %c0_i32 : i32, i32
  }
}

</mosaic_0001>

<bundles_post_ra>
// kernel: tpu_custom_call.1
= control target key start
LH: loop header
LB: loop body
LE: loop exit
PB: predicated region body
PF: predicated region fallthrough
CT: control target
= control target key end

     0   :  { %7 = vsyncpa [#allocation3], 0  ;;  %s160_s0 = inlined_call_operand.hbm [shape: u32[4,512], index: 0, kind: input, shape index: {}]   ;;  %s161_s1 = inlined_call_operand.hbm [shape: f32[4,512], index: 1, kind: input, shape index: {}]   ;;  %s162_s2 = inlined_call_operand.hbm [shape: f32[4,512], index: 2, kind: output, shape index: {}]  }
   0x1   :  { %8 = vsyncpa [#allocation6], 0 }
   0x2   :  { %9 = vsyncpa [#allocation4], 0  ;;  %s133_s9 = smov [#allocation2]   ;;  %s134_s11 = smov [#allocation5]  }
   0x3   :  { %s16_s10 = sshll.u32 %s133_s9, 4  ;;  %s26_s12 = sshll.u32 %s134_s11, 4  ;;  %s17_s10 = int_to_ptr.vmem [resolvable:$true] %s16_s10  ;;  %s27_s12 = int_to_ptr.vmem [resolvable:$true] %s26_s12 }
   0x4   :  { %s75_s13 = scalar_lea.vmem %s17_s10, 256  ;;  %p80_p1 = scmp.lt.s32.totalorder %s17_s10, %s17_s10 }
   0x5   :  { %p76_p0 = scmp.ne.s32.totalorder %s17_s10, %s75_s13  ;;  %p81_p2 = scmp.lt.s32.totalorder %s75_s13, %s75_s13 }
   0x7   :  { %p82_p3 = por %p81_p2, %p80_p1 }
   0x9   :  { %p83_p4 = pnand %p82_p3, %p76_p0 }
   0xb   :  { %86 = shalt.err (!%p83_p4)
}
   0xc   :  { %19 = dma.hbm_to_vmem [thread:$0]  %s160_s0, 256, %s17_s10, [#allocation3]  }
   0xd   :  { %s95_s16 = scalar_lea.vmem %s27_s12, 256  ;;  %p100_p6 = scmp.lt.s32.totalorder %s27_s12, %s27_s12 }
   0xe   :  { %p96_p5 = scmp.ne.s32.totalorder %s27_s12, %s95_s16  ;;  %p101_p7 = scmp.lt.s32.totalorder %s95_s16, %s95_s16 }
  0x10   :  { %p102_p8 = por %p101_p7, %p100_p6 }
  0x12   :  { %p103_p9 = pnand %p102_p8, %p96_p5 }
  0x14   :  { %106 = shalt.err (!%p103_p9)
}
  0x15   :  { %29 = dma.hbm_to_vmem [thread:$0]  %s161_s1, 256, %s27_s12, [#allocation6]  }
  0x16   :  { %127 = dma.done.wait [#allocation3], 256  }
  0x17   :  { %128 = vsyncadd [#allocation3], 4294967040 }
  0x18   :  { %129 = dma.done.wait [#allocation6], 256  }
  0x19   :  { %130 = vsyncadd [#allocation6], 4294967040  ;;  %v36_v0 = vld [vmem:[#allocation2] sm:$0xff]  ;;  %v40_v1 = vld [vmem:[#allocation5] sm:$0xff]  ;;  %s135_s0 = smov [#allocation7]  }
  0x1a   :  { %v37_v2 = vld [vmem:[#allocation2 + $0x8] sm:$0xff]  ;;  %vm38_vm0 = vcmp.ge.u32.totalorder %v36_v0, 1288490189  ;;  %v42_v3 = vmul.f32 1.4285715, %v40_v1  ;;  %s54_s19 = sshll.u32 %s135_s0, 4  ;;  %s55_s19 = int_to_ptr.vmem [resolvable:$true] %s54_s19 }
  0x1b   :  { %vm39_vm1 = vcmp.ge.u32.totalorder %v37_v2, 1288490189  ;;  %v41_v4 = vld [vmem:[#allocation5 + $0x8] sm:$0xff]  ;;  %s107_s1 = scalar_lea.vmem %s55_s19, 256  ;;  %p112_p11 = scmp.lt.s32.totalorder %s55_s19, %s55_s19 }
  0x1c   :  { %v44_v5 = vsel %vm38_vm0, %v42_v3, 0.0  ;;  %v43_v6 = vmul.f32 1.4285715, %v41_v4  ;;  %p108_p10 = scmp.ne.s32.totalorder %s55_s19, %s107_s1  ;;  %p113_p12 = scmp.lt.s32.totalorder %s107_s1, %s107_s1 }
  0x1d   :  { %46 = vst [vmem:[#allocation7] sm:$0xff] %v44_v5 }
  0x1e   :  { %v45_v7 = vsel %vm39_vm1, %v43_v6, 0.0  ;;  %p114_p13 = por %p113_p12, %p112_p11 }
  0x1f   :  { %47 = vst [vmem:[#allocation7 + $0x8] sm:$0xff] %v45_v7 }
  0x20   :  { %p115_p0 = pnand %p114_p13, %p108_p10 }
  0x22   :  { %118 = shalt.err (!%p115_p0)
}
  0x23   :  { %57 = dma.vmem_to_hbm [thread:$0]  %s55_s19, 256, %s162_s2, [#allocation4]  }
  0x24   :  { %131 = dma.done.wait [#allocation4], 256  }
  0x25   :  { %132 = vsyncadd [#allocation4], 4294967040 }
  0x26   :  { %61 = vsyncpa [#allocation3], 1 }
  0x27   :  { %62 = vsyncpa [#allocation6], 1 }
  0x28   :  { %63 = vsyncpa [#allocation4], 1 }

</bundles_post_ra>
